<compile_context>
chip_gen: v7x
topology: tpu7x:2x2x1
jax: 0.10.0
libtpu: 0.0.40
codegen_flags: <defaults>
</compile_context>

<pallas_src>
import functools
import math

import jax
import jax.numpy as jnp
from jax import lax
from jax.experimental import pallas as pl
from jax.experimental.pallas import tpu as pltpu


def _round_up(x, m):
    return (x + m - 1) // m * m


def _vmem_capacity_bytes():
    try:
        return int(pltpu.get_tpu_info().vmem_capacity_bytes)
    except Exception:
        return 64 * 1024 * 1024        # conservative: v7x per-TensorCore VMEM


def _pick_feature_tile(features, mem_dim, itemsize, vmem_cap):
    """Pick a lane-dense feature tile (~1-8 MiB of memory tile per step)."""
    tile_budget = max(1 << 20, min(vmem_cap // 16, 8 << 20))
    tf_cap = max(128, (tile_budget // max(mem_dim * itemsize, 1)) // 128 * 128)
    if features % 128 == 0:
        # Largest multiple-of-128 divisor of `features` within the budget:
        # no feature padding -> no per-call padded copy of the bank.
        n = features // 128
        best = 1
        for d in range(1, int(math.isqrt(n)) + 1):
            if n % d == 0:
                for cand in (d, n // d):
                    if cand * 128 <= tf_cap:
                        best = max(best, cand)
        return best * 128
    return min(tf_cap, _round_up(features, 128))


# ---------------------------------------------------------------------------
# Fused kernel (bank fits in VMEM): one HBM read of the memory bank total.
# Grid: feature tiles ("arbitrary" — reduction + resident output block).
# ---------------------------------------------------------------------------
def _fused_kernel(z_ref, mem_ref, o_ref, bank_ref, dots_ref, zsq_ref, msq_ref,
                  *, addressing, threshold, num_f_tiles, feature_tile):
    k = pl.program_id(0)

    @pl.when(k == 0)
    def _init():
        dots_ref[...] = jnp.zeros_like(dots_ref)
        zsq_ref[...] = jnp.zeros_like(zsq_ref)
        msq_ref[...] = jnp.zeros_like(msq_ref)

    z = z_ref[...].astype(jnp.float32)            # (b_pad, tile_f)
    m = mem_ref[...].astype(jnp.float32)          # (MEM_DIM, tile_f)

    # Stash this tile on-chip (bf16) so the readout never re-reads HBM.
    bank_ref[k] = mem_ref[...].astype(jnp.bfloat16)

    # Partial z . m^T (f32 operands / f32 accumulate: the sparse threshold
    # gate downstream is sensitive to logit precision).
    dots_ref[...] += lax.dot_general(
        z, m, (((1,), (1,)), ((), ())), preferred_element_type=jnp.float32)

    # Partial squared norms.  The per-row memory norm is produced directly in
    # a (1, MEM_DIM) lane-major layout via a ones-row matmul, so no XLU
    # transpose is needed at finalize time.
    zsq_ref[...] += jnp.sum(z * z, axis=1, keepdims=True)
    ones_row = jnp.ones((1, m.shape[1]), dtype=jnp.float32)
    msq_ref[...] += lax.dot_general(
        ones_row, m * m, (((1,), (1,)), ((), ())),
        preferred_element_type=jnp.float32)

    @pl.when(k == num_f_tiles - 1)
    def _finalize():
        denom = jnp.maximum(
            jnp.sqrt(zsq_ref[...]) * jnp.sqrt(msq_ref[...]), 1e-8)
        logits = dots_ref[...] / denom            # (b_pad, MEM_DIM), f32
        mx = jnp.max(logits, axis=1, keepdims=True)
        e = jnp.exp(logits - mx)
        w = e / jnp.sum(e, axis=1, keepdims=True)
        if addressing == "sparse":
            diff = w - threshold
            w = jnp.maximum(diff, 0.0) * w / (jnp.abs(diff) + 1e-12)
            l1 = jnp.sum(jnp.abs(w), axis=1, keepdims=True)
            # Post-gate rescale only: approximate EUP reciprocal is safe.
            w = w * pl.reciprocal(jnp.maximum(l1, 1e-12), approx=True)
        w16 = w.astype(jnp.bfloat16)              # cast once
        # Readout from the VMEM-resident bank, one static tile at a time.
        for j in range(num_f_tiles):
            r = jnp.dot(w16, bank_ref[j], preferred_element_type=jnp.float32)
            o_ref[:, j * feature_tile:(j + 1) * feature_tile] = (
                r.astype(o_ref.dtype))


# ---------------------------------------------------------------------------
# Streaming fallback, pass 1: addressing weights.  Dots accumulate directly
# in the resident f32 output block; finalize overwrites it with the weights.
# ---------------------------------------------------------------------------
def _weights_kernel(z_ref, mem_ref, w_ref, zsq_ref, msq_ref, *,
                    addressing, threshold):
    k = pl.program_id(0)

    @pl.when(k == 0)
    def _init():
        w_ref[...] = jnp.zeros_like(w_ref)
        zsq_ref[...] = jnp.zeros_like(zsq_ref)
        msq_ref[...] = jnp.zeros_like(msq_ref)

    z = z_ref[...].astype(jnp.float32)
    m = mem_ref[...].astype(jnp.float32)
    w_ref[...] += lax.dot_general(
        z, m, (((1,), (1,)), ((), ())), preferred_element_type=jnp.float32)
    zsq_ref[...] += jnp.sum(z * z, axis=1, keepdims=True)
    ones_row = jnp.ones((1, m.shape[1]), dtype=jnp.float32)
    msq_ref[...] += lax.dot_general(
        ones_row, m * m, (((1,), (1,)), ((), ())),
        preferred_element_type=jnp.float32)

    @pl.when(k == pl.num_programs(0) - 1)
    def _finalize():
        denom = jnp.maximum(
            jnp.sqrt(zsq_ref[...]) * jnp.sqrt(msq_ref[...]), 1e-8)
        logits = w_ref[...] / denom
        mx = jnp.max(logits, axis=1, keepdims=True)
        e = jnp.exp(logits - mx)
        w = e / jnp.sum(e, axis=1, keepdims=True)
        if addressing == "sparse":
            diff = w - threshold
            w = jnp.maximum(diff, 0.0) * w / (jnp.abs(diff) + 1e-12)
            l1 = jnp.sum(jnp.abs(w), axis=1, keepdims=True)
            w = w * pl.reciprocal(jnp.maximum(l1, 1e-12), approx=True)
        w_ref[...] = w


# ---------------------------------------------------------------------------
# Streaming fallback, pass 2: z_hat tile = weights @ memory tile.
# Weights arrive already bf16 (cast once in the wrapper).
# ---------------------------------------------------------------------------
def _readout_kernel(w_ref, mem_ref, o_ref):
    o_ref[...] = jnp.dot(
        w_ref[...], mem_ref[...].astype(jnp.bfloat16),
        preferred_element_type=jnp.float32).astype(o_ref.dtype)


def memory_unit_forward(x, memory, addressing="sparse", feature_tile=None,
                        force_path=None):
    """JAX/Pallas equivalent of MemoryUnit.forward.

    x:       (b, F) or (b, C, L) or (b, C, H, W)
    memory:  (MEM_DIM, features) with features == prod(x.shape[1:]).
    force_path: None (auto) | "fused" | "streaming"  (testing / tuning knob).
    """
    if addressing not in ("sparse", "soft"):
        raise ValueError("addressing must be 'sparse' or 'soft'")
    shape = x.shape
    if len(shape) not in (2, 3, 4):
        raise NotImplementedError
    b = int(shape[0])
    features = 1
    for s in shape[1:]:
        features *= int(s)
    mem_dim = int(memory.shape[0])
    assert int(memory.shape[1]) == features
    threshold = 1.0 / mem_dim

    z = x.reshape(b, features)

    vmem_cap = _vmem_capacity_bytes()
    mem_itemsize = int(jnp.dtype(memory.dtype).itemsize)
    z_itemsize = int(jnp.dtype(z.dtype).itemsize)
    out_itemsize = int(jnp.dtype(x.dtype).itemsize)

    if feature_tile is None:
        feature_tile = _pick_feature_tile(features, mem_dim, mem_itemsize,
                                          vmem_cap)
    else:
        feature_tile = max(128, _round_up(int(feature_tile), 128))
    f_pad = _round_up(features, feature_tile)
    num_f_tiles = f_pad // feature_tile

    b_pad = _round_up(b, 8)       # sublane quantum: full vregs, dense stores

    # Zero padding is exact: padded feature columns add nothing to dots or
    # norms, and padded batch rows produce all-zero outputs (sliced off).
    if (b_pad, f_pad) != (b, features):
        z_p = jnp.zeros((b_pad, f_pad), z.dtype).at[:b, :features].set(z)
    else:
        z_p = z
    if f_pad != features:
        # TODO(synk): for a stateful module, cache this padded bank at init
        # time instead of rebuilding it every forward call.
        mem_p = (jnp.zeros((mem_dim, f_pad), memory.dtype)
                 .at[:, :features].set(memory))
    else:
        mem_p = memory

    # ---- VMEM accounting & path selection ----------------------------------
    in_tile_bytes = feature_tile * (mem_dim * mem_itemsize + b_pad * z_itemsize)
    bank_bytes = mem_dim * f_pad * 2                     # bf16 VMEM stash
    acc_bytes = (b_pad * mem_dim + b_pad + mem_dim) * 4
    out_block_bytes = b_pad * f_pad * out_itemsize
    fused_need = (bank_bytes + 2 * in_tile_bytes + 2 * out_block_bytes
                  + acc_bytes + (1 << 20))
    use_fused = fused_need <= int(0.75 * vmem_cap)
    if force_path == "fused":
        use_fused = True
    elif force_path == "streaming":
        use_fused = False

    total_flops = int(4 * b_pad * mem_dim * f_pad + 4 * mem_dim * f_pad)
    hbm_bytes_once = int(b_pad * f_pad * z_itemsize
                         + mem_dim * f_pad * mem_itemsize
                         + b_pad * f_pad * out_itemsize)

    if use_fused:
        vmem_limit = int(min(max(2 * fused_need, 32 << 20),
                             int(0.9 * vmem_cap)))
        out_p = pl.pallas_call(
            functools.partial(_fused_kernel, addressing=addressing,
                              threshold=threshold, num_f_tiles=num_f_tiles,
                              feature_tile=feature_tile),
            out_shape=jax.ShapeDtypeStruct((b_pad, f_pad), x.dtype),
            grid=(num_f_tiles,),
            in_specs=[
                pl.BlockSpec((b_pad, feature_tile), lambda k: (0, k)),
                pl.BlockSpec((mem_dim, feature_tile), lambda k: (0, k)),
            ],
            out_specs=pl.BlockSpec((b_pad, f_pad), lambda k: (0, 0)),
            scratch_shapes=[
                pltpu.VMEM((num_f_tiles, mem_dim, feature_tile), jnp.bfloat16),
                pltpu.VMEM((b_pad, mem_dim), jnp.float32),   # dots acc
                pltpu.VMEM((b_pad, 1), jnp.float32),         # ||z||^2 acc
                pltpu.VMEM((1, mem_dim), jnp.float32),       # ||m_row||^2 acc
            ],
            compiler_params=pltpu.CompilerParams(
                dimension_semantics=("arbitrary",),
                vmem_limit_bytes=vmem_limit),
            cost_estimate=pl.CostEstimate(
                flops=total_flops,
                transcendentals=int(b_pad * mem_dim),
                bytes_accessed=hbm_bytes_once),
        )(z_p, mem_p)
    else:
        vmem_limit = int(min(max(6 * in_tile_bytes + (8 << 20), 32 << 20),
                             int(0.9 * vmem_cap)))
        weights = pl.pallas_call(
            functools.partial(_weights_kernel, addressing=addressing,
                              threshold=threshold),
            out_shape=jax.ShapeDtypeStruct((b_pad, mem_dim), jnp.float32),
            grid=(num_f_tiles,),
            in_specs=[
                pl.BlockSpec((b_pad, feature_tile), lambda k: (0, k)),
                pl.BlockSpec((mem_dim, feature_tile), lambda k: (0, k)),
            ],
            out_specs=pl.BlockSpec((b_pad, mem_dim), lambda k: (0, 0)),
            scratch_shapes=[
                pltpu.VMEM((b_pad, 1), jnp.float32),
                pltpu.VMEM((1, mem_dim), jnp.float32),
            ],
            compiler_params=pltpu.CompilerParams(
                dimension_semantics=("arbitrary",),
                vmem_limit_bytes=vmem_limit),
            cost_estimate=pl.CostEstimate(
                flops=int(2 * b_pad * mem_dim * f_pad + 4 * mem_dim * f_pad),
                transcendentals=int(b_pad * mem_dim),
                bytes_accessed=int(b_pad * f_pad * z_itemsize
                                   + mem_dim * f_pad * mem_itemsize
                                   + b_pad * mem_dim * 4)),
        )(z_p, mem_p)

        w16 = weights.astype(jnp.bfloat16)   # cast once, not per grid step

        out_p = pl.pallas_call(
            _readout_kernel,
            out_shape=jax.ShapeDtypeStruct((b_pad, f_pad), x.dtype),
            grid=(num_f_tiles,),
            in_specs=[
                pl.BlockSpec((b_pad, mem_dim), lambda k: (0, 0)),   # resident
                pl.BlockSpec((mem_dim, feature_tile), lambda k: (0, k)),
            ],
            out_specs=pl.BlockSpec((b_pad, feature_tile), lambda k: (0, k)),
            compiler_params=pltpu.CompilerParams(
                dimension_semantics=("parallel",),
                vmem_limit_bytes=vmem_limit),
            cost_estimate=pl.CostEstimate(
                flops=int(2 * b_pad * mem_dim * f_pad),
                transcendentals=0,
                bytes_accessed=int(mem_dim * f_pad * mem_itemsize
                                   + b_pad * mem_dim * 2
                                   + b_pad * f_pad * out_itemsize)),
        )(w16, mem_p)

    out = out_p
    if (b_pad, f_pad) != (b, features):
        out = out[:b, :features]
    return out.reshape(shape)


def _reference_forward(x, memory, addressing="sparse"):
    # Pure-JAX reference mirroring the PyTorch module.
    shape = x.shape
    b = shape[0]
    features = memory.shape[1]
    z = x.reshape(b, features).astype(jnp.float32)
    m = memory.astype(jnp.float32)
    zn = jnp.linalg.norm(z, axis=1, keepdims=True)
    mn = jnp.linalg.norm(m, axis=1, keepdims=True)
    logit = (z @ m.T) / jnp.maximum(zn * mn.T, 1e-8)
    w = jax.nn.softmax(logit, axis=1)
    if addressing == "sparse":
        t = 1.0 / memory.shape[0]
        w = jnp.maximum(w - t, 0.0) * w / (jnp.abs(w - t) + 1e-12)
        w = w / jnp.maximum(jnp.sum(jnp.abs(w), axis=1, keepdims=True), 1e-12)
    return (w @ m).reshape(shape)


if __name__ == "__main__":
    # Small shapes consistent with a 4-D conv-feature input: (b, C, H, W).
    b, C, H, W = 2, 4, 16, 16
    MEM_DIM = 64
    features = C * H * W

    key = jax.random.PRNGKey(0)
    kx, kmem = jax.random.split(key)

    x = jax.random.normal(kx, (b, C, H, W), dtype=jnp.float32)

    # Deterministic kaiming_uniform_ analogue for the memory bank:
    # bound = sqrt(2/(1+a^2)) * sqrt(3/fan_in) with a=0, fan_in=features.
    bound = math.sqrt(2.0) * math.sqrt(3.0 / features)
    memory = jax.random.uniform(
        kmem, (MEM_DIM, features), dtype=jnp.float32,
        minval=-bound, maxval=bound)

    ref_sparse = _reference_forward(x, memory, "sparse")
    ref_soft = _reference_forward(x, memory, "soft")

    def check(out, ref):
        assert out.shape == ref.shape
        # Tolerance covers the bf16-operand / f32-accumulate readout matmul.
        assert jnp.allclose(out, ref, atol=1e-3, rtol=1e-2), (
            float(jnp.max(jnp.abs(out - ref))))

    # 1) Default path: fused, bank resident in VMEM, single feature tile.
    out = jax.block_until_ready(memory_unit_forward(x, memory, "sparse"))
    check(out, ref_sparse)

    # 2) Fused path with multiple feature tiles (exercises the VMEM bank stash).
    out = jax.block_until_ready(memory_unit_forward(
        x, memory, "sparse", feature_tile=256, force_path="fused"))
    check(out, ref_sparse)

    # 3) Two-pass streaming fallback (large-bank path).
    out = jax.block_until_ready(memory_unit_forward(
        x, memory, "sparse", feature_tile=256, force_path="streaming"))
    check(out, ref_sparse)

    # 4) Soft addressing.
    out = jax.block_until_ready(memory_unit_forward(x, memory, "soft"))
    check(out, ref_soft)

    print("KERNEL_OK")
</pallas_src>

<mosaic_0001>
module attributes {stable_mosaic.version = 11 : i64} {
  func.func @_fused_kernel(%arg0: i32, %arg1: memref<8x1024xf32, #tpu.memory_space<vmem>>, %arg2: memref<64x1024xf32, #tpu.memory_space<vmem>>, %arg3: memref<8x1024xf32, #tpu.memory_space<vmem>>, %arg4: memref<1x64x1024xbf16, #tpu.memory_space<vmem>>, %arg5: memref<8x64xf32, #tpu.memory_space<vmem>>, %arg6: memref<8x1xf32, #tpu.memory_space<vmem>>, %arg7: memref<1x64xf32, #tpu.memory_space<vmem>>) attributes {dimension_semantics = [#tpu.dimension_semantics<arbitrary>], iteration_bounds = array<i64: 1>, scalar_prefetch = 0 : i64, scratch_operands = 4 : i64, tpu.core_type = #tpu.core_type<tc>, window_params = [{transform_indices = @transform_0, window_bounds = array<i64: 8, 1024>}, {transform_indices = @transform_1, window_bounds = array<i64: 64, 1024>}, {pipeline_mode = #tpu.pipeline_mode<synchronous>, transform_indices = @transform_2, window_bounds = array<i64: 8, 1024>}]} {
    %c0_i32 = arith.constant 0 : i32
    %0 = arith.cmpi eq, %arg0, %c0_i32 : i32
    %1 = arith.extui %0 : i1 to i32
    %c0_i32_0 = arith.constant 0 : i32
    %2 = arith.cmpi ne, %1, %c0_i32_0 : i32
    scf.if %2 {
      %cst_25 = arith.constant 0.000000e+00 : f32
      %30 = vector.broadcast %cst_25 : f32 to vector<8x64xf32>
      %c0_26 = arith.constant 0 : index
      %c0_27 = arith.constant 0 : index
      %31 = vector.load %arg5[%c0_26, %c0_27] : memref<8x64xf32, #tpu.memory_space<vmem>>, vector<8x64xf32>
      tpu.vector_store %arg5[%c0_26, %c0_27], %30 {strides = array<i32>} : memref<8x64xf32, #tpu.memory_space<vmem>>, vector<8x64xf32>,
      %cst_28 = arith.constant 0.000000e+00 : f32
      %32 = vector.broadcast %cst_28 : f32 to vector<8x1xf32>
      %c0_29 = arith.constant 0 : index
      %c0_30 = arith.constant 0 : index
      %33 = vector.load %arg6[%c0_29, %c0_30] : memref<8x1xf32, #tpu.memory_space<vmem>>, vector<8x1xf32>
      tpu.vector_store %arg6[%c0_29, %c0_30], %32 {strides = array<i32>} : memref<8x1xf32, #tpu.memory_space<vmem>>, vector<8x1xf32>,
      %cst_31 = arith.constant 0.000000e+00 : f32
      %34 = vector.broadcast %cst_31 : f32 to vector<1x64xf32>
      %c0_32 = arith.constant 0 : index
      %c0_33 = arith.constant 0 : index
      %35 = vector.load %arg7[%c0_32, %c0_33] : memref<1x64xf32, #tpu.memory_space<vmem>>, vector<1x64xf32>
      tpu.vector_store %arg7[%c0_32, %c0_33], %34 {strides = array<i32>} : memref<1x64xf32, #tpu.memory_space<vmem>>, vector<1x64xf32>,
    } else {
    }
    %c0 = arith.constant 0 : index
    %c0_1 = arith.constant 0 : index
    %3 = vector.load %arg1[%c0, %c0_1] : memref<8x1024xf32, #tpu.memory_space<vmem>>, vector<8x1024xf32>
    %c0_2 = arith.constant 0 : index
    %c0_3 = arith.constant 0 : index
    %4 = vector.load %arg2[%c0_2, %c0_3] : memref<64x1024xf32, #tpu.memory_space<vmem>>, vector<64x1024xf32>
    %c0_4 = arith.constant 0 : index
    %c0_5 = arith.constant 0 : index
    %5 = vector.load %arg2[%c0_4, %c0_5] : memref<64x1024xf32, #tpu.memory_space<vmem>>, vector<64x1024xf32>
    %6 = arith.truncf %5 : vector<64x1024xf32> to vector<64x1024xbf16>
    %7 = arith.index_cast %arg0 : i32 to index
    %c0_6 = arith.constant 0 : index
    %c0_7 = arith.constant 0 : index
    %8 = vector.load %arg4[%7, %c0_6, %c0_7] : memref<1x64x1024xbf16, #tpu.memory_space<vmem>>, vector<1x64x1024xbf16>
    %9 = vector.shape_cast %8 : vector<1x64x1024xbf16> to vector<64x1024xbf16>
    %10 = vector.shape_cast %6 : vector<64x1024xbf16> to vector<1x64x1024xbf16>
    tpu.vector_store %arg4[%7, %c0_6, %c0_7], %10 {strides = array<i32>} : memref<1x64x1024xbf16, #tpu.memory_space<vmem>>, vector<1x64x1024xbf16>,
    %c0_8 = arith.constant 0 : index
    %c0_9 = arith.constant 0 : index
    %11 = vector.load %arg5[%c0_8, %c0_9] : memref<8x64xf32, #tpu.memory_space<vmem>>, vector<8x64xf32>
    %cst = arith.constant dense<0.000000e+00> : vector<8x64xf32>
    %12 = tpu.matmul %3, %4, %cst {dimension_numbers = #tpu.dot_dimension_numbers<[1], [1], [0], [0], [0, 0, 1, 0], [], []>} : vector<8x1024xf32>, vector<64x1024xf32>, vector<8x64xf32> -> vector<8x64xf32>
    %13 = arith.addf %11, %12 : vector<8x64xf32>
    %c0_10 = arith.constant 0 : index
    %c0_11 = arith.constant 0 : index
    %14 = vector.load %arg5[%c0_10, %c0_11] : memref<8x64xf32, #tpu.memory_space<vmem>>, vector<8x64xf32>
    tpu.vector_store %arg5[%c0_10, %c0_11], %13 {strides = array<i32>} : memref<8x64xf32, #tpu.memory_space<vmem>>, vector<8x64xf32>,
    %c0_12 = arith.constant 0 : index
    %c0_13 = arith.constant 0 : index
    %15 = vector.load %arg6[%c0_12, %c0_13] : memref<8x1xf32, #tpu.memory_space<vmem>>, vector<8x1xf32>
    %16 = arith.mulf %3, %3 : vector<8x1024xf32>
    %cst_14 = arith.constant dense<0.000000e+00> : vector<8xf32>
    %17 = vector.multi_reduction <add>, %16, %cst_14 [1] : vector<8x1024xf32> to vector<8xf32>
    %18 = vector.shape_cast %17 : vector<8xf32> to vector<8x1xf32>
    %19 = arith.addf %15, %18 : vector<8x1xf32>
    %c0_15 = arith.constant 0 : index
    %c0_16 = arith.constant 0 : index
    %20 = vector.load %arg6[%c0_15, %c0_16] : memref<8x1xf32, #tpu.memory_space<vmem>>, vector<8x1xf32>
    tpu.vector_store %arg6[%c0_15, %c0_16], %19 {strides = array<i32>} : memref<8x1xf32, #tpu.memory_space<vmem>>, vector<8x1xf32>,
    %cst_17 = arith.constant 1.000000e+00 : f32
    %21 = vector.broadcast %cst_17 : f32 to vector<1x1024xf32>
    %c0_18 = arith.constant 0 : index
    %c0_19 = arith.constant 0 : index
    %22 = vector.load %arg7[%c0_18, %c0_19] : memref<1x64xf32, #tpu.memory_space<vmem>>, vector<1x64xf32>
    %23 = arith.mulf %4, %4 : vector<64x1024xf32>
    %cst_20 = arith.constant dense<0.000000e+00> : vector<1x64xf32>
    %24 = tpu.matmul %21, %23, %cst_20 {dimension_numbers = #tpu.dot_dimension_numbers<[1], [1], [0], [0], [0, 0, 1, 0], [], []>} : vector<1x1024xf32>, vector<64x1024xf32>, vector<1x64xf32> -> vector<1x64xf32>
    %25 = arith.addf %22, %24 : vector<1x64xf32>
    %c0_21 = arith.constant 0 : index
    %c0_22 = arith.constant 0 : index
    %26 = vector.load %arg7[%c0_21, %c0_22] : memref<1x64xf32, #tpu.memory_space<vmem>>, vector<1x64xf32>
    tpu.vector_store %arg7[%c0_21, %c0_22], %25 {strides = array<i32>} : memref<1x64xf32, #tpu.memory_space<vmem>>, vector<1x64xf32>,
    %c0_i32_23 = arith.constant 0 : i32
    %27 = arith.cmpi eq, %arg0, %c0_i32_23 : i32
    %28 = arith.extui %27 : i1 to i32
    %c0_i32_24 = arith.constant 0 : i32
    %29 = arith.cmpi ne, %28, %c0_i32_24 : i32
    scf.if %29 {
      %c0_25 = arith.constant 0 : index
      %c0_26 = arith.constant 0 : index
      %30 = vector.load %arg6[%c0_25, %c0_26] : memref<8x1xf32, #tpu.memory_space<vmem>>, vector<8x1xf32>
      %31 = math.sqrt %30 : vector<8x1xf32>
      %c0_27 = arith.constant 0 : index
      %c0_28 = arith.constant 0 : index
      %32 = vector.load %arg7[%c0_27, %c0_28] : memref<1x64xf32, #tpu.memory_space<vmem>>, vector<1x64xf32>
      %33 = math.sqrt %32 : vector<1x64xf32>
      %34 = vector.broadcast %31 : vector<8x1xf32> to vector<8x64xf32>
      %35 = vector.broadcast %33 : vector<1x64xf32> to vector<8x64xf32>
      %36 = arith.mulf %34, %35 : vector<8x64xf32>
      %cst_29 = arith.constant 9.99999993E-9 : f32
      %37 = vector.broadcast %cst_29 : f32 to vector<8x64xf32>
      %38 = arith.maximumf %36, %37 : vector<8x64xf32>
      %c0_30 = arith.constant 0 : index
      %c0_31 = arith.constant 0 : index
      %39 = vector.load %arg5[%c0_30, %c0_31] : memref<8x64xf32, #tpu.memory_space<vmem>>, vector<8x64xf32>
      %40 = arith.divf %39, %38 : vector<8x64xf32>
      %cst_32 = arith.constant dense<0xFF800000> : vector<8xf32>
      %41 = vector.multi_reduction <maximumf>, %40, %cst_32 [1] : vector<8x64xf32> to vector<8xf32>
      %42 = vector.shape_cast %41 : vector<8xf32> to vector<8x1xf32>
      %43 = vector.broadcast %42 : vector<8x1xf32> to vector<8x64xf32>
      %44 = arith.subf %40, %43 : vector<8x64xf32>
      %45 = math.exp %44 : vector<8x64xf32>
      %cst_33 = arith.constant dense<0.000000e+00> : vector<8xf32>
      %46 = vector.multi_reduction <add>, %45, %cst_33 [1] : vector<8x64xf32> to vector<8xf32>
      %47 = vector.shape_cast %46 : vector<8xf32> to vector<8x1xf32>
      %48 = vector.broadcast %47 : vector<8x1xf32> to vector<8x64xf32>
      %49 = arith.divf %45, %48 : vector<8x64xf32>
      %cst_34 = arith.constant 1.562500e-02 : f32
      %50 = vector.broadcast %cst_34 : f32 to vector<8x64xf32>
      %51 = arith.subf %49, %50 : vector<8x64xf32>
      %cst_35 = arith.constant 0.000000e+00 : f32
      %52 = vector.broadcast %cst_35 : f32 to vector<8x64xf32>
      %53 = arith.maximumf %51, %52 : vector<8x64xf32>
      %54 = arith.mulf %53, %49 : vector<8x64xf32>
      %55 = math.absf %51 : vector<8x64xf32>
      %cst_36 = arith.constant 9.99999996E-13 : f32
      %56 = vector.broadcast %cst_36 : f32 to vector<8x64xf32>
      %57 = arith.addf %55, %56 : vector<8x64xf32>
      %58 = arith.divf %54, %57 : vector<8x64xf32>
      %59 = math.absf %58 : vector<8x64xf32>
      %cst_37 = arith.constant dense<0.000000e+00> : vector<8xf32>
      %60 = vector.multi_reduction <add>, %59, %cst_37 [1] : vector<8x64xf32> to vector<8xf32>
      %61 = vector.shape_cast %60 : vector<8xf32> to vector<8x1xf32>
      %cst_38 = arith.constant 9.99999996E-13 : f32
      %62 = vector.broadcast %cst_38 : f32 to vector<8x1xf32>
      %63 = arith.maximumf %61, %62 : vector<8x1xf32>
      %64 = tpu.reciprocal %63 {approx = true} : vector<8x1xf32> -> vector<8x1xf32>
      %65 = vector.broadcast %64 : vector<8x1xf32> to vector<8x64xf32>
      %66 = arith.mulf %58, %65 : vector<8x64xf32>
      %67 = arith.truncf %66 : vector<8x64xf32> to vector<8x64xbf16>
      %c0_39 = arith.constant 0 : index
      %c0_40 = arith.constant 0 : index
      %c0_41 = arith.constant 0 : index
      %68 = vector.load %arg4[%c0_39, %c0_40, %c0_41] : memref<1x64x1024xbf16, #tpu.memory_space<vmem>>, vector<1x64x1024xbf16>
      %69 = vector.shape_cast %68 : vector<1x64x1024xbf16> to vector<64x1024xbf16>
      %cst_42 = arith.constant dense<0.000000e+00> : vector<8x1024xf32>
      %70 = tpu.matmul %67, %69, %cst_42 {dimension_numbers = #tpu.dot_dimension_numbers<[1], [0], [0], [1], [0, 0, 1, 1], [], []>} : vector<8x64xbf16>, vector<64x1024xbf16>, vector<8x1024xf32> -> vector<8x1024xf32>
      %c0_43 = arith.constant 0 : index
      %c0_44 = arith.constant 0 : index
      %71 = vector.load %arg3[%c0_43, %c0_44] : memref<8x1024xf32, #tpu.memory_space<vmem>>, vector<8x1024xf32>
      tpu.vector_store %arg3[%c0_43, %c0_44], %70 {strides = array<i32>} : memref<8x1024xf32, #tpu.memory_space<vmem>>, vector<8x1024xf32>,
    } else {
    }
    return
  }
  func.func @transform_0(%arg0: i32) -> (i32, i32) {
    %c0_i32 = arith.constant 0 : i32
    %c0_i32_0 = arith.constant 0 : i32
    return %c0_i32, %arg0 : i32, i32
  }
  func.func @transform_1(%arg0: i32) -> (i32, i32) {
    %c0_i32 = arith.constant 0 : i32
    %c0_i32_0 = arith.constant 0 : i32
    return %c0_i32, %arg0 : i32, i32
  }
  func.func @transform_2(%arg0: i32) -> (i32, i32) {
    %c0_i32 = arith.constant 0 : i32
    %c0_i32_0 = arith.constant 0 : i32
    %c0_i32_1 = arith.constant 0 : i32
    return %c0_i32, %c0_i32_0 : i32, i32
  }
}

</mosaic_0001>

<bundles_post_ra>
// kernel: tpu_custom_call.1
= control target key start
LH: loop header
LB: loop body
LE: loop exit
PB: predicated region body
PF: predicated region fallthrough
CT: control target
= control target key end

     0   :  { %7 = vsyncpa [#allocation7], 0  ;;  %s1916_s0 = inlined_call_operand.hbm [shape: f32[8,1024], index: 0, kind: input, shape index: {}]   ;;  %s1917_s1 = inlined_call_operand.hbm [shape: f32[64,1024], index: 1, kind: input, shape index: {}]   ;;  %s1918_s2 = inlined_call_operand.hbm [shape: f32[8,1024], index: 2, kind: output, shape index: {}]  }
   0x1   :  { %8 = vsyncpa [#allocation10], 0 }
   0x2   :  { %9 = vsyncpa [#allocation8], 0  ;;  %s1353_s9 = smov [#allocation6]   ;;  %s1354_s11 = smov [#allocation9]  }
   0x3   :  { %s16_s10 = sshll.u32 %s1353_s9, 4  ;;  %s25_s12 = sshll.u32 %s1354_s11, 4  ;;  %s17_s10 = int_to_ptr.vmem [resolvable:$true] %s16_s10  ;;  %s1376_s12 = int_to_ptr.vmem [resolvable:$true] %s25_s12 }
   0x4   :  { %s1281_s15 = scalar_lea.hbm %s1916_s0, 1024 }
   0x5   :  { %p1282_p0 = scmp.ne.s32.totalorder %s1916_s0, %s1281_s15  ;;  %p1285_p1 = scmp.lt.u32.totalorder %s1281_s15, %s1916_s0 }
   0x7   :  { %p1287_p2 = pnand %p1285_p1, %p1282_p0 }
   0x9   :  { %1290 = shalt.err (!%p1287_p2)
}
   0xa   :  { %s1291_s20 = scalar_lea.vmem %s17_s10, 1024  ;;  %p1296_p4 = scmp.lt.s32.totalorder %s17_s10, %s17_s10 }
   0xb   :  { %p1292_p3 = scmp.ne.s32.totalorder %s17_s10, %s1291_s20  ;;  %p1297_p5 = scmp.lt.s32.totalorder %s1291_s20, %s1291_s20 }
   0xd   :  { %p1298_p6 = por %p1297_p5, %p1296_p4 }
   0xf   :  { %p1299_p7 = pnand %p1298_p6, %p1292_p3 }
  0x11   :  { %1302 = shalt.err (!%p1299_p7)
}
  0x12   :  { %19 = dma.hbm_to_vmem [thread:$0]  %s1916_s0, 1024, %s17_s10, [#allocation7]  }
  0x13   :  { %s1303_s25 = scalar_lea.hbm %s1917_s1, 8192 }
  0x14   :  { %p1304_p8 = scmp.ne.s32.totalorder %s1917_s1, %s1303_s25  ;;  %p1307_p9 = scmp.lt.u32.totalorder %s1303_s25, %s1917_s1 }
  0x16   :  { %p1309_p10 = pnand %p1307_p9, %p1304_p8 }
  0x18   :  { %1312 = shalt.err (!%p1309_p10)
}
  0x19   :  { %s1313_s30 = scalar_lea.vmem %s1376_s12, 8192  ;;  %p1318_p12 = scmp.lt.s32.totalorder %s1376_s12, %s1376_s12 }
  0x1a   :  { %p1314_p11 = scmp.ne.s32.totalorder %s1376_s12, %s1313_s30  ;;  %p1319_p13 = scmp.lt.s32.totalorder %s1313_s30, %s1313_s30 }
  0x1c   :  { %p1320_p0 = por %p1319_p13, %p1318_p12 }
  0x1e   :  { %p1321_p1 = pnand %p1320_p0, %p1314_p11 }
  0x20   :  { %1324 = shalt.err (!%p1321_p1)
}
  0x21   :  { %s1355_s0 = smov 1024   ;;  %s1356_s3 = smov 64  }
  0x22   :  { %31 = dma.hbm_to_vmem [thread:$0]  %s1917_s1, 8192, %s1376_s12, [#allocation10], %s1355_s0, %s1355_s0, %s1356_s3  }
  0x23   :  { %1347 = dma.done.wait [#allocation7], 1024  }
  0x24   :  { %1348 = vsyncadd [#allocation7], 4294966272 }
  0x25   :  { %1349 = dma.done.wait [#allocation10], 8192  }
  0x26   :  { %1350 = vsyncadd [#allocation10], 4294959104  ;;  %v1407_v0 = vld [vmem:[#allocation9 + $0x8] sm:$0xff]  ;;  %v1411_v2 = vld [vmem:[#allocation9] sm:$0xff]  ;;  %vm45_vm0 = vcmask 7168   ;;  %v1919_v40 = vmov 0.0  }
  0x27   :  { %v1409_v1 = vld [vmem:[#allocation9 + $0x48] sm:$0xff]  ;;  %v1417_v4 = vld [vmem:[#allocation9 + $0x40] sm:$0xff]  ;;  %v1419_v5 = vld [vmem:[#allocation9 + $0x18] sm:$0xff]  ;;  %46 = vst.msk [vmem:[#allocation4] sm:$0xff] %vm45_vm0, %v1919_v40  ;;  %vm43_vm1 = vcmask 523264   ;;  %vm47_vm4 = vcmask 516096  }
  0x28   :  { %v1415_v3 = vpack.c.bf16 %v1409_v1, %v1407_v0  ;;  %v1421_v6 = vld [vmem:[#allocation9 + $0x58] sm:$0xff]  ;;  %v1425_v7 = vpack.c.bf16 %v1417_v4, %v1411_v2  ;;  %v1431_v9 = vld [vmem:[#allocation9 + $0x10] sm:$0xff]  ;;  %v1435_v11 = vld [vmem:[#allocation9 + $0x88] sm:$0xff]  ;;  %s1360_s1 = smov [#allocation11]  }
  0x29   :  { %v1429_v8 = vpack.c.bf16 %v1421_v6, %v1419_v5  ;;  %v1433_v10 = vld [vmem:[#allocation9 + $0x50] sm:$0xff]  ;;  %v1442_v13 = vld [vmem:[#allocation9 + $0xc8] sm:$0xff]  ;;  %v1450_v15 = vld [vmem:[#allocation9 + $0x98] sm:$0xff]  ;;  %s1115_s6 = sshll.u32 %s1360_s1, 4  ;;  %s1116_s6 = int_to_ptr.vmem [resolvable:$true] %s1115_s6 }
  0x2a   :  { %1963 = vst [vmem:[#allocation15_spill] sm:$0xff] %v1415_v3  ;;  %1964 = vst [vmem:[#allocation16_spill] sm:$0xff] %v1425_v7  ;;  %1131 = vmatprep.subr.bf16.mxu0 %v1415_v3  ;;  %v1440_v12 = vpack.c.bf16 %v1433_v10, %v1431_v9  ;;  %v1448_v14 = vpack.c.bf16 %v1442_v13, %v1435_v11  ;;  %v1452_v16 = vld [vmem:[#allocation9 + $0xd8] sm:$0xff]  ;;  %v1455_v17 = vld [vmem:[#allocation9 + $0x80] sm:$0xff]  ;;  %s1325_s7 = scalar_lea.vmem %s1116_s6, 1024  ;;  %p1330_p3 = scmp.lt.s32.totalorder %s1116_s6, %s1116_s6 }
  0x2b   :  { %1965 = vst [vmem:[#allocation17_spill] sm:$0xff] %v1429_v8  ;;  %1133 = vmatpush1.bf16.xpose.msra.mxu0 %v1425_v7  ;;  %1147 = vmatprep.subr.bf16.mxu1 %v1429_v8  ;;  %v1457_v18 = vld [vmem:[#allocation9 + $0xc0] sm:$0xff]  ;;  %v1461_v19 = vpack.c.bf16 %v1452_v16, %v1450_v15  ;;  %v1463_v20 = vld [vmem:[#allocation9 + $0x90] sm:$0xff]  ;;  %v1468_v22 = vld [vmem:[#allocation9 + $0x108] sm:$0xff]  ;;  %p1326_p2 = scmp.ne.s32.totalorder %s1116_s6, %s1325_s7  ;;  %p1331_p4 = scmp.lt.s32.totalorder %s1325_s7, %s1325_s7 }
  0x2c   :  { %1966 = vst [vmem:[#allocation18_spill] sm:$0xff] %v1440_v12  ;;  %1967 = vst [vmem:[#allocation19_spill] sm:$0xff] %v1448_v14  ;;  %1149 = vmatpush1.bf16.xpose.msra.mxu1 %v1440_v12  ;;  %1135 = vmatprep.subr.bf16.mxu0 %v1448_v14  ;;  %v1466_v21 = vld [vmem:[#allocation9 + $0xd0] sm:$0xff]  ;;  %v1470_v23 = vld [vmem:[#allocation9 + $0x148] sm:$0xff]  ;;  %v1479_v26 = vpack.c.bf16 %v1457_v18, %v1455_v17 }
  0x2d   :  { %1968 = vst [vmem:[#allocation20_spill] sm:$0xff] %v1461_v19  ;;  %1151 = vmatprep.subr.bf16.mxu1 %v1461_v19  ;;  %v1473_v24 = vld [vmem:[#allocation9 + $0x118] sm:$0xff]  ;;  %v1483_v27 = vpack.c.bf16 %v1466_v21, %v1463_v20  ;;  %v1487_v28 = vpack.c.bf16 %v1470_v23, %v1468_v22  ;;  %v50_v30 = vld [vmem:[#allocation6 + $0x8] sm:$0xff]  ;;  %v1493_v32 = vld [vmem:[#allocation6] sm:$0xff]  ;;  %p1332_p5 = por %p1331_p4, %p1330_p3 }
  0x2e   :  { %v1475_v25 = vld [vmem:[#allocation9 + $0x158] sm:$0xff]  ;;  %1969 = vst [vmem:[#allocation21_spill] sm:$0xff] %v1479_v26  ;;  %253 = vmatprep.mubr.f32.mxu0 %v50_v30  ;;  %v474_v31 = vmul.f32 %v50_v30, %v50_v30  ;;  %v473_v34 = vmul.f32 %v1493_v32, %v1493_v32  ;;  %v1498_v35 = vld [vmem:[#allocation6 + $0x10] sm:$0xff]  ;;  %v1502_v36 = vld [vmem:[#allocation9 + $0x100] sm:$0xff] }
  0x2f   :  { %1970 = vst [vmem:[#allocation22_spill] sm:$0xff] %v1483_v27  ;;  %1971 = vst [vmem:[#allocation23_spill] sm:$0xff] %v1487_v28  ;;  %v1491_v29 = vpack.c.bf16 %v1475_v25, %v1473_v24  ;;  %v52_v33 = vld [vmem:[#allocation6 + $0x18] sm:$0xff]  ;;  %v1504_v37 = vld [vmem:[#allocation9 + $0x140] sm:$0xff]  ;;  %v475_v39 = vmul.f32 %v1498_v35, %v1498_v35  ;;  %p1333_p6 = pnand %p1332_p5, %p1326_p2 }
  0x30   :  { %323 = vmatprep.mubr.f32.mxu1 %v52_v33  ;;  %v1506_v38 = vld [vmem:[#allocation9 + $0x110] sm:$0xff]  ;;  %v1515_v42 = vld [vmem:[#allocation9 + $0x188] sm:$0xff]  ;;  %v481_v44 = vadd.f32 %v474_v31, %v473_v34  ;;  %v1519_v45 = vld [vmem:[#allocation9 + $0x198] sm:$0xff]  ;;  %v1525_v47 = vpack.c.bf16 %v1504_v37, %v1502_v36  ;;  %v476_v50 = vmul.f32 %v52_v33, %v52_v33 }
  0x31   :  { %1972 = vst [vmem:[#allocation24_spill] sm:$0xff] %v1491_v29  ;;  %v1513_v41 = vld [vmem:[#allocation9 + $0x150] sm:$0xff]  ;;  %v1517_v43 = vld [vmem:[#allocation9 + $0x1c8] sm:$0xff]  ;;  %v1521_v46 = vld [vmem:[#allocation9 + $0x1d8] sm:$0xff] }
  0x32   :  { %1973 = vst [vmem:[#allocation25_spill] sm:$0xff] %v1525_v47  ;;  %v1529_v48 = vpack.c.bf16 %v1513_v41, %v1506_v38  ;;  %v1533_v49 = vpack.c.bf16 %v1517_v43, %v1515_v42  ;;  %v482_v51 = vadd.f32 %v481_v44, %v475_v39  ;;  %v1537_v52 = vpack.c.bf16 %v1521_v46, %v1519_v45  ;;  %v1540_v53 = vld [vmem:[#allocation9 + $0x180] sm:$0xff]  ;;  %v1546_v55 = vld [vmem:[#allocation9 + $0x190] sm:$0xff]  ;;  %v1550_v57 = vld [vmem:[#allocation9 + $0x28] sm:$0xff] }
  0x33   :  { %1137 = vmatpush1.bf16.xpose.msra.mxu0 %v1479_v26  ;;  %v1542_v54 = vld [vmem:[#allocation9 + $0x1c0] sm:$0xff]  ;;  %v1548_v56 = vld [vmem:[#allocation9 + $0x1d0] sm:$0xff]  ;;  %v1553_v59 = vld [vmem:[#allocation9 + $0x68] sm:$0xff] }
  0x34   :  { %1153 = vmatpush1.bf16.xpose.msra.mxu1 %v1483_v27  ;;  %1139 = vmatprep.subr.bf16.mxu0 %v1487_v28  ;;  %1974 = vst [vmem:[#allocation26_spill] sm:$0xff] %v1529_v48  ;;  %1975 = vst [vmem:[#allocation27_spill] sm:$0xff] %v1533_v49  ;;  %v483_v58 = vadd.f32 %v482_v51, %v476_v50  ;;  %v1555_v60 = vld [vmem:[#allocation9 + $0x38] sm:$0xff]  ;;  %v1557_v61 = vld [vmem:[#allocation6 + $0x20] sm:$0xff]  ;;  %v1567_v33 = vpack.c.bf16 %v1542_v54, %v1540_v53 }
  0x35   :  { %1155 = vmatprep.subr.bf16.mxu1 %v1491_v29  ;;  %1976 = vst [vmem:[#allocation28_spill] sm:$0xff] %v1537_v52  ;;  %v1559_v62 = vld [vmem:[#allocation9 + $0x78] sm:$0xff]  ;;  %v54_v63 = vld [vmem:[#allocation6 + $0x28] sm:$0xff]  ;;  %v1561_v30 = vld [vmem:[#allocation6 + $0x30] sm:$0xff]  ;;  %v477_v31 = vmul.f32 %v1557_v61, %v1557_v61  ;;  %v1571_v44 = vpack.c.bf16 %v1548_v56, %v1546_v55  ;;  %v1575_v50 = vpack.c.bf16 %v1553_v59, %v1550_v57 }
  0x36   :  { %1977 = vst [vmem:[#allocation29_spill] sm:$0xff] %v1567_v33  ;;  %v56_v34 = vld [vmem:[#allocation6 + $0x38] sm:$0xff]  ;;  %v478_v39 = vmul.f32 %v54_v63, %v54_v63  ;;  %v479_v51 = vmul.f32 %v1561_v30, %v1561_v30  ;;  %v1588_v29 = vld [vmem:[#allocation9 + $0x60] sm:$0xff]  ;;  %v1590_v28 = vld [vmem:[#allocation9 + $0x30] sm:$0xff] }
  0x37   :  { %1978 = vst [vmem:[#allocation30_spill] sm:$0xff] %v1571_v44  ;;  %1979 = vst [vmem:[#allocation31_spill] sm:$0xff] %v1575_v50  ;;  %v484_v40 = vadd.f32 %v483_v58, %v477_v31  ;;  %v1593_v58 = vld [vmem:[#allocation9 + $0x70] sm:$0xff]  ;;  %v1595_v31 = vld [vmem:[#allocation9 + $0xa8] sm:$0xff] }
  0x38   :  { %v1628_v26 = vld [vmem:[#allocation9 + $0xb0] sm:$0xff]  ;;  %v1633_v19 = vld [vmem:[#allocation9 + $0x128] sm:$0xff]  ;;  %v1662_v14 = vld [vmem:[#allocation9 + $0x160] sm:$0xff] }
  0x39   :  { %1992 = vst [vmem:[#allocation44_spill] sm:$0xff] %v1662_v14  ;;  %v1664_v12 = vld [vmem:[#allocation9 + $0x130] sm:$0xff]  ;;  %v1669_v8 = vld [vmem:[#allocation9 + $0x1a8] sm:$0xff] }
  0x3a   :  { %v1667_v7 = vld [vmem:[#allocation9 + $0x170] sm:$0xff]  ;;  %1994 = vst [vmem:[#allocation46_spill] sm:$0xff] %v1669_v8  ;;  %v1671_v3 = vld [vmem:[#allocation9 + $0x1e8] sm:$0xff] }
  0x3b   :  { %1141 = vmatpush1.bf16.xpose.msra.mxu0 %v1525_v47  ;;  %v1586_v47 = vld [vmem:[#allocation9 + $0x20] sm:$0xff]  ;;  %1993 = vst [vmem:[#allocation45_spill] sm:$0xff] %v1667_v7  ;;  %1995 = vst [vmem:[#allocation47_spill] sm:$0xff] %v1671_v3 }
  0x3c   :  { %1157 = vmatpush1.bf16.xpose.msra.mxu1 %v1529_v48  ;;  %1143 = vmatprep.subr.bf16.mxu0 %v1533_v49  ;;  %v480_v49 = vmul.f32 %v56_v34, %v56_v34  ;;  %v485_v48 = vadd.f32 %v484_v40, %v478_v39  ;;  %v1597_v40 = vld [vmem:[#allocation9 + $0xe8] sm:$0xff]  ;;  %v1599_v39 = vld [vmem:[#allocation9 + $0xb8] sm:$0xff] }
  0x3d   :  { %1159 = vmatprep.subr.bf16.mxu1 %v1537_v52  ;;  %v1581_v52 = vpack.c.bf16 %v1559_v62, %v1555_v60 }
  0x3e   :  { %v486_v27 = vadd.f32 %v485_v48, %v479_v51  ;;  %v1609_v48 = vpack.c.bf16 %v1593_v58, %v1590_v28  ;;  %v1613_v51 = vpack.c.bf16 %v1597_v40, %v1595_v31 }
  0x3f   :  { %1980 = vst [vmem:[#allocation32_spill] sm:$0xff] %v1581_v52 }
  0x40   :  { %1982 = vst [vmem:[#allocation34_spill] sm:$0xff] %v1609_v48  ;;  %1983 = vst [vmem:[#allocation35_spill] sm:$0xff] %v1613_v51 }
  0x43   :  { %1145 = vmatpush1.bf16.xpose.msra.mxu0 %v1567_v33  ;;  %v1605_v33 = vpack.c.bf16 %v1588_v29, %v1586_v47 }
  0x44   :  { %1161 = vmatpush1.bf16.xpose.msra.mxu1 %v1571_v44  ;;  %1163 = vmatprep.subr.bf16.mxu0 %v1575_v50  ;;  %v1601_v44 = vld [vmem:[#allocation9 + $0xf8] sm:$0xff]  ;;  %v487_v50 = vadd.f32 %v486_v27, %v480_v49  ;;  %v1624_v27 = vld [vmem:[#allocation9 + $0xa0] sm:$0xff] }
  0x45   :  { %1179 = vmatprep.subr.bf16.mxu1 %v1581_v52  ;;  %1981 = vst [vmem:[#allocation33_spill] sm:$0xff] %v1605_v33  ;;  %v1617_v52 = vpack.c.bf16 %v1601_v44, %v1599_v39  ;;  %v1626_v49 = vld [vmem:[#allocation9 + $0xe0] sm:$0xff] }
  0x46   :  { %488 = vadd.xlane.f32.xlu0 %v487_v50  ;;  %v1631_v50 = vld [vmem:[#allocation9 + $0xf0] sm:$0xff] }
  0x47   :  { %1984 = vst [vmem:[#allocation36_spill] sm:$0xff] %v1617_v52 }
  0x4a   :  { %254 = vmatmul.mubr.f32.vlgmr.msra.gmra.mrb[0].mxu0 %v1493_v32  ;;  %v1635_v32 = vld [vmem:[#allocation9 + $0x168] sm:$0xff] }
  0x4b   :  { %324 = vmatmul.mubr.f32.vlgmr.msra.gmra.mrb[0].mxu1 %v1498_v35  ;;  %1165 = vmatpush1.bf16.xpose.msra.mxu0 %v1605_v33  ;;  %1985 = vst [vmem:[#allocation37_spill] sm:$0xff] %v1635_v32  ;;  %v1637_v35 = vld [vmem:[#allocation9 + $0x138] sm:$0xff]  ;;  %v1647_v33 = vpack.c.bf16 %v1631_v50, %v1628_v26 }
  0x4c   :  { %1181 = vmatpush1.bf16.xpose.msra.mxu1 %v1609_v48  ;;  %1167 = vmatprep.subr.bf16.mxu0 %v1613_v51  ;;  %1986 = vst [vmem:[#allocation38_spill] sm:$0xff] %v1637_v35  ;;  %v1639_v48 = vld [vmem:[#allocation9 + $0x178] sm:$0xff]  ;;  %v1643_v51 = vpack.c.bf16 %v1626_v49, %v1624_v27 }
  0x4d   :  { %1183 = vmatprep.subr.bf16.mxu1 %v1617_v52  ;;  %393 = vmatprep.mubr.f32.mxu0 %v54_v63  ;;  %1987 = vst [vmem:[#allocation39_spill] sm:$0xff] %v1639_v48  ;;  %1989 = vst [vmem:[#allocation41_spill] sm:$0xff] %v1647_v33  ;;  %v1651_v52 = vpack.c.bf16 %v1635_v32, %v1633_v19  ;;  %v1655_v63 = vpack.c.bf16 %v1639_v48, %v1637_v35  ;;  %v1673_v48 = vld [vmem:[#allocation9 + $0x1b8] sm:$0xff]  ;;  %v1955_v32 = vmov 0  }
  0x4e   :  { %463 = vmatprep.mubr.f32.mxu1 %v56_v34  ;;  %1988 = vst [vmem:[#allocation40_spill] sm:$0xff] %v1643_v51  ;;  %v1660_v34 = vld [vmem:[#allocation9 + $0x120] sm:$0xff]  ;;  %1996 = vst [vmem:[#allocation48_spill] sm:$0xff] %v1673_v48  ;;  %1266 = vset.pattern.permute.xlu0 %v1955_v32  ;;  %v505_v32 = vmul.f32 %v1421_v6, %v1421_v6  ;;  %v502_v6 = vmul.f32 %v1417_v4, %v1417_v4 }
  0x4f   :  { %1990 = vst [vmem:[#allocation42_spill] sm:$0xff] %v1651_v52  ;;  %1991 = vst [vmem:[#allocation43_spill] sm:$0xff] %v1655_v63  ;;  %v513_v4 = vmul.f32 %v1450_v15, %v1450_v15  ;;  %v520_v15 = vmul.f32 %v1466_v21, %v1466_v21 }
  0x53   :  { %1169 = vmatpush1.bf16.xpose.msra.mxu0 %v1643_v51  ;;  %v1675_v51 = vld [vmem:[#allocation9 + $0x1f8] sm:$0xff] }
  0x54   :  { %1185 = vmatpush1.bf16.xpose.msra.mxu1 %v1647_v33  ;;  %1171 = vmatprep.subr.bf16.mxu0 %v1651_v52  ;;  %1997 = vst [vmem:[#allocation49_spill] sm:$0xff] %v1675_v51  ;;  %v1679_v52 = vpack.c.bf16 %v1662_v14, %v1660_v34  ;;  %v1683_v33 = vpack.c.bf16 %v1667_v7, %v1664_v12 }
  0x55   :  { %1187 = vmatprep.subr.bf16.mxu1 %v1655_v63  ;;  %v1687_v63 = vpack.c.bf16 %v1671_v3, %v1669_v8  ;;  %v1691_v35 = vpack.c.bf16 %v1675_v51, %v1673_v48  ;;  %v495_v14 = vmul.f32 %v1407_v0, %v1407_v0  ;;  %v503_v7 = vmul.f32 %v1409_v1, %v1409_v1  ;;  %v1701_v3 = vld [vmem:[#allocation9 + $0x1a0] sm:$0xff]  ;;  %v1710_v0 = vld [vmem:[#allocation9 + $0x1b0] sm:$0xff] }
  0x56   :  { %1998 = vst [vmem:[#allocation50_spill] sm:$0xff] %v1679_v52  ;;  %1999 = vst [vmem:[#allocation51_spill] sm:$0xff] %v1683_v33  ;;  %v1703_v8 = vld [vmem:[#allocation9 + $0x1e0] sm:$0xff]  ;;  %v497_v51 = vmul.f32 %v1419_v5, %v1419_v5  ;;  %v494_v5 = vmul.f32 %v1411_v2, %v1411_v2  ;;  %v519_v2 = vmul.f32 %v1442_v13, %v1442_v13 }
  0x57   :  { %2000 = vst [vmem:[#allocation52_spill] sm:$0xff] %v1687_v63  ;;  %2001 = vst [vmem:[#allocation53_spill] sm:$0xff] %v1691_v35  ;;  %v1716_v1 = vpack.c.bf16 %v1703_v8, %v1701_v3  ;;  %v512_v13 = vmul.f32 %v1463_v20, %v1463_v20  ;;  %v1359_v20 = vmov 1.0  }
  0x58   :  { %2002 = vst [vmem:[#allocation54_spill] sm:$0xff] %v1703_v8  ;;  %v1210_v48 = vpack.c.bf16 %v505_v32, %v497_v51  ;;  %v504_v8 = vmul.f32 %v1433_v10, %v1433_v10 }
  0x5b   :  { %1173 = vmatpush1.bf16.xpose.msra.mxu0 %v1679_v52  ;;  %v1712_v52 = vld [vmem:[#allocation9 + $0x1f0] sm:$0xff] }
  0x5c   :  { %1189 = vmatpush1.bf16.xpose.msra.mxu1 %v1683_v33  ;;  %1175 = vmatprep.subr.bf16.mxu0 %v1687_v63  ;;  %v1720_v63 = vpack.c.bf16 %v1712_v52, %v1710_v0  ;;  %v1194_v33 = vpack.c.bf16 %v503_v7, %v495_v14  ;;  %v511_v7 = vmul.f32 %v1435_v11, %v1435_v11 }
  0x5d   :  { %1191 = vmatprep.subr.bf16.mxu1 %v1691_v35  ;;  %v496_v35 = vmul.f32 %v1431_v9, %v1431_v9  ;;  %v521_v9 = vmul.f32 %v1452_v16, %v1452_v16  ;;  %v1196_v14 = vpack.c.bf16 %v502_v6, %v494_v5  ;;  %v518_v11 = vmul.f32 %v1457_v18, %v1457_v18 }
  0x5e   :  { %v1198_v32 = vpack.c.bf16 %v519_v2, %v511_v7  ;;  %v535_v16 = vmul.f32 %v1470_v23, %v1470_v23  ;;  %v537_v18 = vmul.f32 %v1475_v25, %v1475_v25  ;;  %v534_v23 = vmul.f32 %v1504_v37, %v1504_v37 }
  0x5f   :  { %v1212_v51 = vpack.c.bf16 %v504_v8, %v496_v35  ;;  %v1214_v10 = vpack.c.bf16 %v521_v9, %v513_v4  ;;  %v527_v8 = vmul.f32 %v1468_v22, %v1468_v22  ;;  %v526_v22 = vmul.f32 %v1502_v36, %v1502_v36 }
  0x60   :  { %v536_v25 = vmul.f32 %v1513_v41, %v1513_v41  ;;  %v543_v35 = vmul.f32 %v1515_v42, %v1515_v42  ;;  %v551_v5 = vmul.f32 %v1517_v43, %v1517_v43  ;;  %v545_v36 = vmul.f32 %v1519_v45, %v1519_v45 }
  0x61   :  { %v553_v37 = vmul.f32 %v1521_v46, %v1521_v46  ;;  %v542_v41 = vmul.f32 %v1540_v53, %v1540_v53  ;;  %v550_v42 = vmul.f32 %v1542_v54, %v1542_v54  ;;  %v544_v43 = vmul.f32 %v1546_v55, %v1546_v55 }
  0x62   :  { %v1206_v7 = vpack.c.bf16 %v551_v5, %v543_v35  ;;  %v552_v45 = vmul.f32 %v1548_v56, %v1548_v56  ;;  %v499_v46 = vmul.f32 %v1550_v57, %v1550_v57  ;;  %v507_v4 = vmul.f32 %v1553_v59, %v1553_v59  ;;  %v2010_v5 = vld [vmem:[#allocation48_spill] sm:$0xff] }
  0x63   :  { %1177 = vmatpush1.bf16.xpose.msra.mxu0 %v1716_v1  ;;  %v1222_v2 = vpack.c.bf16 %v553_v37, %v545_v36  ;;  %v501_v53 = vmul.f32 %v1555_v60, %v1555_v60  ;;  %v509_v54 = vmul.f32 %v1559_v62, %v1559_v62  ;;  %v1208_v55 = vpack.c.bf16 %v550_v42, %v542_v41  ;;  %v2011_v36 = vld [vmem:[#allocation49_spill] sm:$0xff]  ;;  %v2012_v41 = vld [vmem:[#allocation54_spill] sm:$0xff] }
  0x64   :  { %1193 = vmatpush1.bf16.xpose.msra.mxu1 %v1720_v63  ;;  %1195 = vmatprep.subr.bf16.mxu0 %v1194_v33  ;;  %v510_v33 = vmul.f32 %v1455_v17, %v1455_v17  ;;  %v529_v17 = vmul.f32 %v1473_v24, %v1473_v24  ;;  %v528_v24 = vmul.f32 %v1506_v38, %v1506_v38 }
  0x65   :  { %1211 = vmatprep.subr.bf16.mxu1 %v1210_v48  ;;  %v1204_v38 = vpack.c.bf16 %v534_v23, %v526_v22  ;;  %v1224_v9 = vpack.c.bf16 %v552_v45, %v544_v43  ;;  %v498_v56 = vmul.f32 %v1586_v47, %v1586_v47  ;;  %v506_v57 = vmul.f32 %v1588_v29, %v1588_v29  ;;  %v2008_v23 = vld [vmem:[#allocation46_spill] sm:$0xff] }
  0x66   :  { %v1200_v21 = vpack.c.bf16 %v518_v11, %v510_v33  ;;  %v1218_v48 = vpack.c.bf16 %v537_v18, %v529_v17  ;;  %v1220_v6 = vpack.c.bf16 %v536_v25, %v528_v24  ;;  %v500_v59 = vmul.f32 %v1590_v28, %v1590_v28  ;;  %v2009_v25 = vld [vmem:[#allocation47_spill] sm:$0xff] }
  0x67   :  { %v508_v60 = vmul.f32 %v1593_v58, %v1593_v58  ;;  %v515_v62 = vmul.f32 %v1595_v31, %v1595_v31  ;;  %v517_v47 = vmul.f32 %v1599_v39, %v1599_v39  ;;  %v525_v29 = vmul.f32 %v1601_v44, %v1601_v44 }
  0x68   :  { %v514_v58 = vmul.f32 %v1624_v27, %v1624_v27  ;;  %v522_v31 = vmul.f32 %v1626_v49, %v1626_v49  ;;  %v524_v44 = vmul.f32 %v1631_v50, %v1631_v50  ;;  %v531_v39 = vmul.f32 %v1633_v19, %v1633_v19 }
  0x69   :  { %v1244_v28 = vpack.c.bf16 %v508_v60, %v500_v59  ;;  %v1246_v11 = vpack.c.bf16 %v525_v29, %v517_v47  ;;  %v530_v19 = vmul.f32 %v1660_v34, %v1660_v34  ;;  %v547_v24 = vmul.f32 %v2008_v23, %v2008_v23  ;;  %v2025_v59 = vld [vmem:[#allocation26_spill] sm:$0xff]  ;;  %v2026_v60 = vld [vmem:[#allocation27_spill] sm:$0xff] }
  0x6a   :  { %394 = vmatmul.mubr.f32.vlgmr.msra.gmra.mrb[2].mxu0 %v1557_v61  ;;  %v1216_v61 = vpack.c.bf16 %v520_v15, %v512_v13  ;;  %v2003_v13 = vld [vmem:[#allocation37_spill] sm:$0xff]  ;;  %v555_v35 = vmul.f32 %v2009_v25, %v2009_v25  ;;  %v549_v34 = vmul.f32 %v2010_v5, %v2010_v5  ;;  %v557_v37 = vmul.f32 %v2011_v36, %v2011_v36  ;;  %v2029_v47 = vld [vmem:[#allocation30_spill] sm:$0xff]  ;;  %v2030_v29 = vld [vmem:[#allocation31_spill] sm:$0xff] }
  0x6b   :  { %1197 = vmatpush1.bf16.xpose.msra.mxu0 %v1196_v14  ;;  %464 = vmatmul.mubr.f32.vlgmr.msra.gmra.mrb[2].mxu1 %v1561_v30  ;;  %v1202_v30 = vpack.c.bf16 %v535_v16, %v527_v8  ;;  %v1226_v14 = vpack.c.bf16 %v507_v4, %v499_v46  ;;  %v539_v15 = vmul.f32 %v2003_v13, %v2003_v13  ;;  %v2004_v8 = vld [vmem:[#allocation38_spill] sm:$0xff]  ;;  %v2005_v16 = vld [vmem:[#allocation39_spill] sm:$0xff] }
  0x6c   :  { %1213 = vmatpush1.bf16.xpose.msra.mxu1 %v1212_v51  ;;  %1199 = vmatprep.subr.bf16.mxu0 %v1198_v32  ;;  %v1242_v51 = vpack.c.bf16 %v509_v54, %v501_v53  ;;  %v523_v32 = vmul.f32 %v1597_v40, %v1597_v40  ;;  %v516_v40 = vmul.f32 %v1628_v26, %v1628_v26  ;;  %v2013_v53 = vld [vmem:[#allocation15_spill] sm:$0xff]  ;;  %v2014_v54 = vld [vmem:[#allocation17_spill] sm:$0xff] }
  0x6d   :  { %1215 = vmatprep.subr.bf16.mxu1 %v1214_v10  ;;  %622 = vmatprep.mubr.f32.mxu0 %v1359_v20  ;;  %v1228_v10 = vpack.c.bf16 %v506_v57, %v498_v56  ;;  %v533_v27 = vmul.f32 %v2004_v8, %v2004_v8  ;;  %v541_v49 = vmul.f32 %v2005_v16, %v2005_v16  ;;  %v2022_v56 = vld [vmem:[#allocation23_spill] sm:$0xff]  ;;  %v2023_v57 = vld [vmem:[#allocation24_spill] sm:$0xff] }
  0x6e   :  { %692 = vmatprep.mubr.f32.mxu1 %v1359_v20  ;;  %v1230_v33 = vpack.c.bf16 %v523_v32, %v515_v62  ;;  %v1232_v26 = vpack.c.bf16 %v522_v31, %v514_v58  ;;  %v1248_v17 = vpack.c.bf16 %v524_v44, %v516_v40  ;;  %v1234_v50 = vpack.c.bf16 %v539_v15, %v531_v39  ;;  %v2027_v62 = vld [vmem:[#allocation28_spill] sm:$0xff]  ;;  %v2028_v32 = vld [vmem:[#allocation29_spill] sm:$0xff] }
  0x6f   :  { %v1250_v18 = vpack.c.bf16 %v541_v49, %v533_v27  ;;  %v554_v42 = vmul.f32 %v2012_v41, %v2012_v41  ;;  %v548_v43 = vmul.f32 %v1710_v0, %v1710_v0  ;;  %v556_v45 = vmul.f32 %v1712_v52, %v1712_v52  ;;  %v2017_v0 = vld [vmem:[#allocation19_spill] sm:$0xff]  ;;  %v2018_v52 = vld [vmem:[#allocation20_spill] sm:$0xff] }
  0x70   :  { %v866_v41 = vlaneseq }
  0x71   :  { %v1256_v4 = vpack.c.bf16 %v556_v45, %v548_v43 }
  0x73   :  { %1201 = vmatpush1.bf16.xpose.msra.mxu0 %v1200_v21  ;;  %v2006_v21 = vld [vmem:[#allocation44_spill] sm:$0xff] }
  0x74   :  { %1217 = vmatpush1.bf16.xpose.msra.mxu1 %v1216_v61  ;;  %1203 = vmatprep.subr.bf16.mxu0 %v1202_v30  ;;  %v538_v61 = vmul.f32 %v2006_v21, %v2006_v21  ;;  %v532_v30 = vmul.f32 %v1664_v12, %v1664_v12 }
  0x75   :  { %1219 = vmatprep.subr.bf16.mxu1 %v1218_v48  ;;  %v2007_v48 = vld [vmem:[#allocation45_spill] sm:$0xff] }
  0x76   :  { %v540_v22 = vmul.f32 %v2007_v48, %v2007_v48 }
  0x78   :  { %v1252_v12 = vpack.c.bf16 %v540_v22, %v532_v30 }
  0x7b   :  { %1205 = vmatpush1.bf16.xpose.msra.mxu0 %v1204_v38  ;;  %v1236_v38 = vpack.c.bf16 %v538_v61, %v530_v19 }
  0x7c   :  { %1221 = vmatpush1.bf16.xpose.msra.mxu1 %v1220_v6  ;;  %1207 = vmatprep.subr.bf16.mxu0 %v1206_v7  ;;  %v1238_v6 = vpack.c.bf16 %v555_v35, %v547_v24  ;;  %v1254_v7 = vpack.c.bf16 %v557_v37, %v549_v34 }
  0x7d   :  { %1223 = vmatprep.subr.bf16.mxu1 %v1222_v2  ;;  %v546_v2 = vmul.f32 %v1701_v3, %v1701_v3  ;;  %v2015_v3 = vld [vmem:[#allocation16_spill] sm:$0xff] }
  0x7f   :  { %v1240_v46 = vpack.c.bf16 %v554_v42, %v546_v2  ;;  %v867_v42 = vshrl.u32 %v866_v41, 7 }
  0x83   :  { %1209 = vmatpush1.bf16.xpose.msra.mxu0 %v1208_v55  ;;  %v2016_v55 = vld [vmem:[#allocation18_spill] sm:$0xff] }
  0x84   :  { %1225 = vmatpush1.bf16.xpose.msra.mxu1 %v1224_v9  ;;  %1227 = vmatprep.subr.bf16.mxu0 %v1226_v14  ;;  %v2019_v9 = vmov 0   ;;  %v2020_v14 = vld [vmem:[#allocation21_spill] sm:$0xff] }
  0x85   :  { %1243 = vmatprep.subr.bf16.mxu1 %v1242_v51  ;;  %v2021_v51 = vld [vmem:[#allocation22_spill] sm:$0xff] }
  0x8a   :  { %623 = vmatmul.mubr.f32.vlgmr.msra.gmra.mrb[4].mxu0 %v1359_v20 }
  0x8b   :  { %693 = vmatmul.mubr.f32.vlgmr.msra.gmra.mrb[4].mxu1 %v1359_v20  ;;  %1229 = vmatpush1.bf16.xpose.msra.mxu0 %v1228_v10  ;;  %v2031_v10 = vld [vmem:[#allocation32_spill] sm:$0xff] }
  0x8c   :  { %1245 = vmatpush1.bf16.xpose.msra.mxu1 %v1244_v28  ;;  %1231 = vmatprep.subr.bf16.mxu0 %v1230_v33  ;;  %v2032_v28 = vmov 0.0   ;;  %v472_v33 = vld [vmem:[#allocation4] sm:$0xff] }
  0x8d   :  { %1247 = vmatprep.subr.bf16.mxu1 %v1246_v11  ;;  %762 = vmatprep.mubr.f32.mxu0 %v1359_v20  ;;  %44 = vst.msk [vmem:[#allocation3] sm:$0xff] %vm43_vm1, %v2032_v28 }
  0x8e   :  { %832 = vmatprep.mubr.f32.mxu1 %v1359_v20  ;;  %48 = vst.msk [vmem:[#allocation5] sm:$0x1] %vm47_vm4, %v2032_v28 }
  0x93   :  { %1233 = vmatpush1.bf16.xpose.msra.mxu0 %v1232_v26 }
  0x94   :  { %1249 = vmatpush1.bf16.xpose.msra.mxu1 %v1248_v17  ;;  %1235 = vmatprep.subr.bf16.mxu0 %v1234_v50  ;;  %v188_v21 = vld [vmem:[#allocation3] sm:$0xff] }
  0x95   :  { %1251 = vmatprep.subr.bf16.mxu1 %v1250_v18 }
  0x9b   :  { %1237 = vmatpush1.bf16.xpose.msra.mxu0 %v1236_v38  ;;  %v493_v38 = vld [vmem:[#allocation5] sm:$0x1] }
  0x9c   :  { %1253 = vmatpush1.bf16.xpose.msra.mxu1 %v1252_v12  ;;  %1239 = vmatprep.subr.bf16.mxu0 %v1238_v6 }
  0x9d   :  { %1255 = vmatprep.subr.bf16.mxu1 %v1254_v7 }
  0xa3   :  { %1241 = vmatpush1.bf16.xpose.msra.mxu0 %v1240_v46  ;;  %v868_v46 = vsub.s32 0, %v867_v42 }
  0xa4   :  { %1257 = vmatpush1.bf16.xpose.msra.mxu1 %v1256_v4  ;;  %937 = vmatprep.subr.bf16.mxu0 %v2013_v53 }
  0xa5   :  { %978 = vmatprep.subr.bf16.mxu1 %v2014_v54 }
  0xaa   :  { %763 = vmatmul.mubr.f32.vlgmr.msra.gmra.mrb[6].mxu0 %v1359_v20 }
  0xab   :  { %833 = vmatmul.mubr.f32.vlgmr.msra.gmra.mrb[6].mxu1 %v1359_v20  ;;  %938 = vmatpush1.bf16.msra.mxu0 %v2015_v3  ;;  %v2024_v20 = vld [vmem:[#allocation25_spill] sm:$0xff] }
  0xac   :  { %979 = vmatpush1.bf16.msra.mxu1 %v2016_v55  ;;  %939 = vmatprep.subr.bf16.mxu0 %v2017_v0 }
  0xad   :  { %980 = vmatprep.subr.bf16.mxu1 %v2018_v52  ;;  %969 = vmatprep.mubr.bf16.mxu0 %v2019_v9 }
  0xae   :  { %1010 = vmatprep.mubr.bf16.mxu1 %v2019_v9 }
  0xaf   :  { %940 = vmatpush1.bf16.msra.mxu0 %v2020_v14 }
  0xb0   :  { %981 = vmatpush1.bf16.msra.mxu1 %v2021_v51  ;;  %941 = vmatprep.subr.bf16.mxu0 %v2022_v56 }
  0xb1   :  { %982 = vmatprep.subr.bf16.mxu1 %v2023_v57 }
  0xb3   :  { %942 = vmatpush1.bf16.msra.mxu0 %v2024_v20 }
  0xb4   :  { %983 = vmatpush1.bf16.msra.mxu1 %v2025_v59  ;;  %943 = vmatprep.subr.bf16.mxu0 %v2026_v60 }
  0xb5   :  { %984 = vmatprep.subr.bf16.mxu1 %v2027_v62 }
  0xb7   :  { %944 = vmatpush1.bf16.msra.mxu0 %v2028_v32 }
  0xb8   :  { %985 = vmatpush1.bf16.msra.mxu1 %v2029_v47  ;;  %1019 = vmatprep.subr.bf16.mxu0 %v2030_v29 }
  0xb9   :  { %1060 = vmatprep.subr.bf16.mxu1 %v2031_v10 }
  0xd3   :  { %v489_v11 = vpop.xlane.xlu0 %488 }
  0xd4   :  { %v490_v58 = vadd.f32 %v489_v11, %v472_v33 }
  0xd6   :  { %492 = vst.msk [vmem:[#allocation4] sm:$0xff] %vm45_vm0, %v490_v58 }
  0xdd   :  { %v844_v31 = vld [vmem:[#allocation4] sm:$0xff] }
  0xde   :  { %1267 = vrsqrt.f32 %v844_v31  ;;  %vm847_vm2 = vcmp.eq.f32.partialorder %v844_v31, inf  ;;  %v850_v44 = vand.u32 2147483648, %v844_v31  ;;  %vm849_vm3 = vcmp.eq.f32.partialorder %v844_v31, 0.0 }
  0xe8   :  { %v1268_v40 = vpop.eup %1267 }
  0xe9   :  { %v846_v39 = vmul.f32 %v1268_v40, %v844_v31 }
  0xeb   :  { %v848_v13 = vsel %vm847_vm2, %v844_v31, %v846_v39 }
  0xec   :  { %v851_v15 = vsel %vm849_vm3, %v850_v44, %v848_v13 }
  0xed   :  { %862 = vperm.xlu0 %1266, %v851_v15  }
 0x11d   :  { %v255_v8 = vpop.f32.mrb[0].mxu0 }
 0x11e   :  { %v257_v27 = vpop.f32.mrb[1].mxu0  ;;  %v325_v16 = vpop.f32.mrb[0].mxu1 }
 0x11f   :  { %v326_v49 = vadd.f32 %v325_v16, %v255_v8  ;;  %v327_v26 = vpop.f32.mrb[1].mxu1 }
 0x120   :  { %v2033_v26 = vld [vmem:[#allocation33_spill] sm:$0xff] }
 0x13d   :  { %v395_v17 = vpop.f32.mrb[2].mxu0 }
 0x13e   :  { %v396_v50 = vadd.f32 %v395_v17, %v326_v49  ;;  %v397_v18 = vpop.f32.mrb[3].mxu0  ;;  %v465_v19 = vpop.f32.mrb[2].mxu1  ;;  %v2034_v17 = vld [vmem:[#allocation34_spill] sm:$0xff] }
 0x13f   :  { %v467_v61 = vpop.f32.mrb[3].mxu1  ;;  %v2036_v18 = vld [vmem:[#allocation36_spill] sm:$0xff] }
 0x140   :  { %v466_v30 = vadd.f32 %v465_v19, %v396_v50  ;;  %v2035_v50 = vld [vmem:[#allocation35_spill] sm:$0xff]  ;;  %v2037_v19 = vld [vmem:[#allocation40_spill] sm:$0xff]  ;;  %v2039_v61 = vld [vmem:[#allocation42_spill] sm:$0xff] }
 0x142   :  { %v469_v48 = vadd.f32 %v466_v30, %v188_v21  ;;  %v2038_v21 = vld [vmem:[#allocation41_spill] sm:$0xff]  ;;  %v2040_v30 = vld [vmem:[#allocation43_spill] sm:$0xff] }
 0x144   :  { %471 = vst.msk [vmem:[#allocation3] sm:$0xff] %vm43_vm1, %v469_v48  ;;  %v2041_v48 = vld [vmem:[#allocation50_spill] sm:$0xff] }
 0x14b   :  { %v873_v51 = vld [vmem:[#allocation3] sm:$0xff] }
 0x15d   :  { %v624_v22 = vpop.f32.mrb[4].mxu0 }
 0x15e   :  { %v626_v23 = vpop.f32.mrb[5].mxu0  ;;  %v694_v24 = vpop.f32.mrb[4].mxu1 }
 0x15f   :  { %v695_v25 = vadd.f32 %v694_v24, %v624_v22  ;;  %v696_v35 = vpop.f32.mrb[5].mxu1  ;;  %v2042_v22 = vld [vmem:[#allocation51_spill] sm:$0xff]  ;;  %v2043_v23 = vld [vmem:[#allocation52_spill] sm:$0xff]  ;;  %v2044_v24 = vld [vmem:[#allocation53_spill] sm:$0xff] }
 0x16c   :  { %v863_v55 = vpop.permute.xlu0 %862 }
 0x17d   :  { %v764_v5 = vpop.f32.mrb[6].mxu0 }
 0x17e   :  { %v765_v34 = vadd.f32 %v764_v5, %v695_v25  ;;  %v766_v36 = vpop.f32.mrb[7].mxu0  ;;  %v834_v37 = vpop.f32.mrb[6].mxu1 }
 0x17f   :  { %v836_v12 = vpop.f32.mrb[7].mxu1 }
 0x180   :  { %v835_v6 = vadd.f32 %v834_v37, %v765_v34 }
 0x182   :  { %v838_v7 = vadd.f32 %v835_v6, %v493_v38 }
 0x184   :  { %840 = vst.msk [vmem:[#allocation5] sm:$0x1] %vm47_vm4, %v838_v7 }
 0x18b   :  { %v852_v2 = vld [vmem:[#allocation5] sm:$0x1] }
 0x18c   :  { %1269 = vrsqrt.f32 %v852_v2  ;;  %vm855_vm5 = vcmp.eq.f32.partialorder %v852_v2, inf  ;;  %v858_v4 = vand.u32 2147483648, %v852_v2  ;;  %vm857_vm6 = vcmp.eq.f32.partialorder %v852_v2, 0.0 }
 0x196   :  { %v1270_v43 = vpop.eup %1269 }
 0x197   :  { %v854_v45 = vmul.f32 %v1270_v43, %v852_v2 }
 0x199   :  { %v856_v53 = vsel %vm855_vm5, %v852_v2, %v854_v45 }
 0x19a   :  { %v859_v54 = vsel %vm857_vm6, %v858_v4, %v856_v53 }
 0x19b   :  { %v869_v3 = vrot.slane %v859_v54, %v868_v46 }
 0x19d   :  { %v871_v0 = vmul.f32 %v869_v3, %v863_v55 }
 0x19f   :  { %v872_v52 = vmax.f32 %v871_v0, 1e-08 }
 0x1a1   :  { %1271 = vrcp.f32 %v872_v52 }
 0x1ab   :  { %v1272_v14 = vpop.eup %1271 }
 0x1ac   :  { %v875_v56 = vmul.f32 %v1272_v14, %v873_v51 }
 0x1ae   :  { %v876_v57 = vsel %vm43_vm1, %v875_v56, -inf }
 0x1af   :  { %877 = vmax.xlane.f32.xlu1 %v876_v57 }
 0x23c   :  { %v878_v20 = vpop.xlane.xlu1 %877 }
 0x23d   :  { %v879_v59 = vsub.f32 %v875_v56, %v878_v20 }
 0x23f   :  { %v880_v60 = vmul.f32 1.442695, %v879_v59 }
 0x241   :  { %1273 = vpow2.f32 %v880_v60 }
 0x24b   :  { %v1274_v62 = vpop.eup %1273 }
 0x24c   :  { %v882_v32 = vsel %vm43_vm1, %v1274_v62, 0.0 }
 0x24d   :  { %883 = vadd.xlane.f32.xlu1 %v882_v32 }
 0x2da   :  { %v884_v47 = vpop.xlane.xlu1 %883 }
 0x2db   :  { %1275 = vrcp.f32 %v884_v47 }
 0x2e5   :  { %v1276_v29 = vpop.eup %1275 }
 0x2e6   :  { %v886_v10 = vmul.f32 %v1276_v29, %v1274_v62 }
 0x2e8   :  { %v1125_v28 = vadd.f32 -0.015625, %v886_v10 }
 0x2ea   :  { %v890_v33 = vand.u32 2147483647, %v1125_v28  ;;  %v888_v58 = vmax.f32 %v1125_v28, 0.0 }
 0x2ec   :  { %v891_v11 = vadd.f32 1e-12, %v890_v33  ;;  %v889_v31 = vmul.f32 %v888_v58, %v886_v10 }
 0x2ee   :  { %1277 = vrcp.f32 %v891_v11 }
 0x2f8   :  { %v1278_v40 = vpop.eup %1277 }
 0x2f9   :  { %v893_v44 = vmul.f32 %v1278_v40, %v889_v31 }
 0x2fb   :  { %v894_v39 = vand.u32 2147483647, %v893_v44 }
 0x2fd   :  { %v895_v13 = vsel %vm43_vm1, %v894_v39, 0.0 }
 0x2fe   :  { %896 = vadd.xlane.f32.xlu1 %v895_v13 }
 0x38b   :  { %v897_v15 = vpop.xlane.xlu1 %896 }
 0x38c   :  { %v898_v8 = vmax.f32 %v897_v15, 1e-12 }
 0x38e   :  { %1279 = vrcp.f32 %v898_v8 }
 0x398   :  { %v1280_v27 = vpop.eup %1279 }
 0x399   :  { %v900_v16 = vmul.f32 %v1280_v27, %v893_v44 }
 0x39b   :  { %v901_v49 = vpack.c.bf16 %v900_v16, %v900_v16 }
 0x39d   :  { %1126 = vmatmul.mubr.msk.bf16.vlgmr.msra.gmra.mrb[8].mxu0 %vm43_vm1, %v901_v49  ;;  %1127 = vmatmul.mubr.msk.bf16.vlgmr.msra.gmra.mrb[8].mxu1 %vm43_vm1, %v901_v49 }
 0x39e   :  { %1020 = vmatpush1.bf16.msra.mxu0 %v2033_v26  ;;  %1061 = vmatpush1.bf16.msra.mxu1 %v2034_v17 }
 0x39f   :  { %1021 = vmatprep.subr.bf16.mxu0 %v2035_v50  ;;  %1062 = vmatprep.subr.bf16.mxu1 %v2036_v18 }
 0x3a0   :  { %1051 = vmatprep.mubr.bf16.mxu0 %v2019_v9  ;;  %1092 = vmatprep.mubr.bf16.mxu1 %v2019_v9 }
 0x3a2   :  { %1022 = vmatpush1.bf16.msra.mxu0 %v2037_v19  ;;  %1063 = vmatpush1.bf16.msra.mxu1 %v2038_v21 }
 0x3a3   :  { %1023 = vmatprep.subr.bf16.mxu0 %v2039_v61  ;;  %1064 = vmatprep.subr.bf16.mxu1 %v2040_v30 }
 0x3a6   :  { %1024 = vmatpush1.bf16.msra.mxu0 %v2041_v48  ;;  %1065 = vmatpush1.bf16.msra.mxu1 %v2042_v22 }
 0x3a7   :  { %1025 = vmatprep.subr.bf16.mxu0 %v2043_v23  ;;  %1066 = vmatprep.subr.bf16.mxu1 %v2044_v24 }
 0x3aa   :  { %1026 = vmatpush1.bf16.msra.mxu0 %v1716_v1  ;;  %1067 = vmatpush1.bf16.msra.mxu1 %v1720_v63 }
 0x3ad   :  { %1128 = vmatmul.mubr.msk.bf16.vlgmr.msra.gmra.mrb[12].mxu0 %vm43_vm1, %v901_v49  ;;  %1129 = vmatmul.mubr.msk.bf16.vlgmr.msra.gmra.mrb[12].mxu1 %vm43_vm1, %v901_v49 }
 0x470   :  { %v971_v9 = vpop.f32.mrb[8].mxu0  ;;  %v1012_v25 = vpop.f32.mrb[8].mxu1 }
 0x471   :  { %1101 = vst [vmem:[#allocation11] sm:$0xff] %v971_v9  ;;  %1103 = vst [vmem:[#allocation11 + $0x10] sm:$0xff] %v1012_v25  ;;  %v973_v35 = vpop.f32.mrb[9].mxu0  ;;  %v1014_v5 = vpop.f32.mrb[9].mxu1 }
 0x472   :  { %1102 = vst [vmem:[#allocation11 + $0x8] sm:$0xff] %v973_v35  ;;  %1104 = vst [vmem:[#allocation11 + $0x18] sm:$0xff] %v1014_v5  ;;  %v975_v34 = vpop.f32.mrb[10].mxu0  ;;  %v1016_v36 = vpop.f32.mrb[10].mxu1 }
 0x473   :  { %v976_v37 = vpop.f32.mrb[11].mxu0  ;;  %v1017_v38 = vpop.f32.mrb[11].mxu1 }
 0x480   :  { %v1053_v1 = vpop.f32.mrb[12].mxu0  ;;  %v1094_v63 = vpop.f32.mrb[12].mxu1 }
 0x481   :  { %1105 = vst [vmem:[#allocation11 + $0x20] sm:$0xff] %v1053_v1  ;;  %1107 = vst [vmem:[#allocation11 + $0x30] sm:$0xff] %v1094_v63  ;;  %v1055_v12 = vpop.f32.mrb[13].mxu0  ;;  %v1096_v6 = vpop.f32.mrb[13].mxu1 }
 0x482   :  { %1106 = vst [vmem:[#allocation11 + $0x28] sm:$0xff] %v1055_v12  ;;  %1108 = vst [vmem:[#allocation11 + $0x38] sm:$0xff] %v1096_v6  ;;  %v1057_v7 = vpop.f32.mrb[14].mxu0  ;;  %v1098_v2 = vpop.f32.mrb[14].mxu1 }
 0x483   :  { %v1058_v41 = vpop.f32.mrb[15].mxu0  ;;  %v1099_v42 = vpop.f32.mrb[15].mxu1 }
 0x484   :  { %1336 = shalt.err (!%p1333_p6)
}
 0x485   :  { %s1337_s10 = scalar_lea.hbm %s1918_s2, 1024 }
 0x486   :  { %p1338_p7 = scmp.ne.s32.totalorder %s1918_s2, %s1337_s10  ;;  %p1341_p8 = scmp.lt.u32.totalorder %s1337_s10, %s1918_s2 }
 0x488   :  { %p1343_p9 = pnand %p1341_p8, %p1338_p7 }
 0x48a   :  { %1346 = shalt.err (!%p1343_p9)
}
 0x48b   :  { %1118 = dma.vmem_to_hbm [thread:$0]  %s1116_s6, 1024, %s1918_s2, [#allocation8]  }
 0x48c   :  { %1351 = dma.done.wait [#allocation8], 1024  }
 0x48d   :  { %1352 = vsyncadd [#allocation8], 4294966272 }
 0x48e   :  { %1122 = vsyncpa [#allocation7], 1 }
 0x48f   :  { %1123 = vsyncpa [#allocation10], 1 }
 0x490   :  { %1124 = vsyncpa [#allocation8], 1 }

</bundles_post_ra>
